<compile_context>
chip_gen: v7x
topology: tpu7x:2x2x1
jax: 0.10.0
libtpu: 0.0.40
codegen_flags: <defaults>
</compile_context>

<pallas_src>
import jax
import jax.numpy as jnp
from jax import lax
from jax.experimental import pallas as pl
from jax.experimental.pallas import tpu as pltpu


def _round_up(n, m):
    return (n + m - 1) // m * m


def rnn_block_kernel(pre_ref, h0_ref, whh_ref, out_ref, hcarry_ref):
    """One grid step == TT RNN timesteps.

    pre_ref   : (TT, Bp, Hp)  precomputed x_t @ W_ih^T + (b_ih + b_hh), streamed
    h0_ref    : (Bp, Hp)      initial hidden (resident; read only at grid step 0)
    whh_ref   : (Hp, Hp)      W_hh^T (resident)
    out_ref   : (TT, Bp, Hp)  hidden after each step (lane-dense stores)
    hcarry_ref: (Bp, Hp)      hidden carried across grid steps (VMEM scratch)
    """

    @pl.when(pl.program_id(0) == 0)
    def _():
        hcarry_ref[...] = h0_ref[...]

    whh = whh_ref[...]          # hoisted: one VMEM->vreg load per TT steps
    h = hcarry_ref[...]         # only VMEM round-trip of h per TT steps
    tt = pre_ref.shape[0]       # static

    def step(t, h):
        h_new = jnp.tanh(
            jnp.dot(h, whh, preferred_element_type=jnp.float32) + pre_ref[t]
        )
        out_ref[t] = h_new
        return h_new

    h = lax.fori_loop(0, tt, step, h, unroll=True)
    hcarry_ref[...] = h


def simple_rnn_sequence(xs, h0, w_ih, w_hh, b_ih, b_hh, block_t=16):
    """Run the RNN cell over a whole sequence.

    xs: (T, B, input_size), h0: (B, hidden_size)
    returns (T, B, hidden_size): hidden state after each step.
    """
    T, B, I = xs.shape
    H = w_ih.shape[0]
    Hp = _round_up(H, 128)
    Bp = _round_up(B, 8)
    TT = max(1, min(block_t, T))
    Tp = _round_up(T, TT)

    # --- One-time parameter prep (hoisted out of the per-step path) ---
    w_ih_p = jnp.zeros((Hp, I), jnp.float32).at[:H, :].set(w_ih.astype(jnp.float32))
    b_p = jnp.zeros((Hp,), jnp.float32).at[:H].set((b_ih + b_hh).astype(jnp.float32))
    w_hh_T = jnp.zeros((Hp, Hp), jnp.float32).at[:H, :H].set(
        w_hh.T.astype(jnp.float32))

    # --- Input projection hoisted out of the recurrence: ONE batched matmul ---
    # (T*B rows at full MXU utilization; bias folded in here.)
    pre = jnp.einsum("tbi,hi->tbh", xs.astype(jnp.float32), w_ih_p,
                     preferred_element_type=jnp.float32) + b_p

    # Pad batch / time to (8, 128)-friendly, lane-dense shapes. Padded rows of
    # pre are zero, so padded hidden rows/cols stay exactly zero in the kernel.
    pre_p = jnp.zeros((Tp, Bp, Hp), jnp.float32).at[:T, :B, :].set(pre)
    h0_p = jnp.zeros((Bp, Hp), jnp.float32).at[:B, :H].set(h0.astype(jnp.float32))

    out = pl.pallas_call(
        rnn_block_kernel,
        out_shape=jax.ShapeDtypeStruct((Tp, Bp, Hp), jnp.float32),
        grid_spec=pltpu.PrefetchScalarGridSpec(
            num_scalar_prefetch=0,
            grid=(Tp // TT,),
            in_specs=[
                pl.BlockSpec((TT, Bp, Hp), lambda g: (g, 0, 0)),  # streamed pre_x
                pl.BlockSpec((Bp, Hp), lambda g: (0, 0)),         # resident h0
                pl.BlockSpec((Hp, Hp), lambda g: (0, 0)),         # resident W_hh^T
            ],
            out_specs=pl.BlockSpec((TT, Bp, Hp), lambda g: (g, 0, 0)),
            scratch_shapes=[
                pltpu.VMEM((Bp, Hp), jnp.float32),  # carried hidden across grid steps
            ],
        ),
        compiler_params=pltpu.CompilerParams(
            dimension_semantics=("arbitrary",),  # recurrence: time axis is sequential
        ),
    )(pre_p, h0_p, w_hh_T)

    return out[:T, :B, :H]


def simple_rnn_forward(x, hidden, w_ih, w_hh, b_ih, b_hh):
    """Single nn.RNNCell step == SimpleRnn.forward: T == 1 case of the fused kernel."""
    return simple_rnn_sequence(x[None], hidden, w_ih, w_hh, b_ih, b_hh)[0]


def init_hidden(batch_size, hidden_size, dtype=jnp.float32):
    return jnp.zeros((batch_size, hidden_size), dtype=dtype)


def _reference_sequence(xs, h0, w_ih, w_hh, b_ih, b_hh):
    h_state = h0
    steps = []
    for t in range(xs.shape[0]):
        h_state = jnp.tanh(xs[t] @ w_ih.T + b_ih + h_state @ w_hh.T + b_hh)
        steps.append(h_state)
    return jnp.stack(steps)


if __name__ == "__main__":
    batch_size = 2
    input_size = 16
    hidden_size = 32
    seq_len = 8

    key = jax.random.PRNGKey(0)
    kx, kxs, kxs2, kih, khh, kbih, kbhh = jax.random.split(key, 7)

    # Deterministic params, mirroring PyTorch's U(-1/sqrt(H), 1/sqrt(H)).
    bound = 1.0 / jnp.sqrt(jnp.float32(hidden_size))
    w_ih = jax.random.uniform(kih, (hidden_size, input_size), jnp.float32, -bound, bound)
    w_hh = jax.random.uniform(khh, (hidden_size, hidden_size), jnp.float32, -bound, bound)
    b_ih = jax.random.uniform(kbih, (hidden_size,), jnp.float32, -bound, bound)
    b_hh = jax.random.uniform(kbhh, (hidden_size,), jnp.float32, -bound, bound)

    x = jax.random.normal(kx, (batch_size, input_size), jnp.float32)
    h0 = init_hidden(batch_size, hidden_size)

    # --- Single-step (the module's forward) ---
    h1 = jax.block_until_ready(simple_rnn_forward(x, h0, w_ih, w_hh, b_ih, b_hh))
    ref1 = jnp.tanh(x @ w_ih.T + b_ih + h0 @ w_hh.T + b_hh)
    assert h1.shape == (batch_size, hidden_size)
    assert jnp.allclose(h1, ref1, atol=1e-5, rtol=1e-5)

    # --- Fused sequence: whole time loop in one pallas_call (single time block) ---
    xs = jax.random.normal(kxs, (seq_len, batch_size, input_size), jnp.float32)
    hs = jax.block_until_ready(simple_rnn_sequence(xs, h0, w_ih, w_hh, b_ih, b_hh))
    ref_seq = _reference_sequence(xs, h0, w_ih, w_hh, b_ih, b_hh)
    assert hs.shape == (seq_len, batch_size, hidden_size)
    assert jnp.allclose(hs, ref_seq, atol=1e-5, rtol=1e-5)

    # --- Longer, non-divisible sequence: exercises multiple grid steps + time pad ---
    seq_len2 = 20
    xs2 = jax.random.normal(kxs2, (seq_len2, batch_size, input_size), jnp.float32)
    hs2 = jax.block_until_ready(
        simple_rnn_sequence(xs2, h0, w_ih, w_hh, b_ih, b_hh, block_t=8))
    ref_seq2 = _reference_sequence(xs2, h0, w_ih, w_hh, b_ih, b_hh)
    assert hs2.shape == (seq_len2, batch_size, hidden_size)
    assert jnp.allclose(hs2, ref_seq2, atol=1e-5, rtol=1e-5)

    print("KERNEL_OK")
</pallas_src>

<mosaic_0001>
module attributes {stable_mosaic.version = 11 : i64} {
  func.func @rnn_block_kernel(%arg0: i32, %arg1: memref<1x8x128xf32, #tpu.memory_space<vmem>>, %arg2: memref<8x128xf32, #tpu.memory_space<vmem>>, %arg3: memref<128x128xf32, #tpu.memory_space<vmem>>, %arg4: memref<1x8x128xf32, #tpu.memory_space<vmem>>, %arg5: memref<8x128xf32, #tpu.memory_space<vmem>>) attributes {dimension_semantics = [#tpu.dimension_semantics<arbitrary>], iteration_bounds = array<i64: 1>, scalar_prefetch = 0 : i64, scratch_operands = 1 : i64, tpu.core_type = #tpu.core_type<tc>, window_params = [{transform_indices = @transform_0, window_bounds = array<i64: 1, 8, 128>}, {pipeline_mode = #tpu.pipeline_mode<synchronous>, transform_indices = @transform_1, window_bounds = array<i64: 8, 128>}, {pipeline_mode = #tpu.pipeline_mode<synchronous>, transform_indices = @transform_2, window_bounds = array<i64: 128, 128>}, {transform_indices = @transform_3, window_bounds = array<i64: 1, 8, 128>}]} {
    %c0_i32 = arith.constant 0 : i32
    %0 = arith.cmpi eq, %arg0, %c0_i32 : i32
    %1 = arith.extui %0 : i1 to i32
    %c0_i32_0 = arith.constant 0 : i32
    %2 = arith.cmpi ne, %1, %c0_i32_0 : i32
    scf.if %2 {
      %c0_11 = arith.constant 0 : index
      %c0_12 = arith.constant 0 : index
      %16 = vector.load %arg2[%c0_11, %c0_12] : memref<8x128xf32, #tpu.memory_space<vmem>>, vector<8x128xf32>
      %c0_13 = arith.constant 0 : index
      %c0_14 = arith.constant 0 : index
      %17 = vector.load %arg5[%c0_13, %c0_14] : memref<8x128xf32, #tpu.memory_space<vmem>>, vector<8x128xf32>
      tpu.vector_store %arg5[%c0_13, %c0_14], %16 {strides = array<i32>} : memref<8x128xf32, #tpu.memory_space<vmem>>, vector<8x128xf32>,
    } else {
    }
    %c0 = arith.constant 0 : index
    %c0_1 = arith.constant 0 : index
    %3 = vector.load %arg3[%c0, %c0_1] : memref<128x128xf32, #tpu.memory_space<vmem>>, vector<128x128xf32>
    %c0_2 = arith.constant 0 : index
    %c0_3 = arith.constant 0 : index
    %4 = vector.load %arg5[%c0_2, %c0_3] : memref<8x128xf32, #tpu.memory_space<vmem>>, vector<8x128xf32>
    %c0_i32_4 = arith.constant 0 : i32
    %cst = arith.constant dense<0.000000e+00> : vector<8x128xf32>
    %5 = tpu.matmul %4, %3, %cst {dimension_numbers = #tpu.dot_dimension_numbers<[1], [0], [0], [1], [0, 0, 1, 1], [], []>} : vector<8x128xf32>, vector<128x128xf32>, vector<8x128xf32> -> vector<8x128xf32>
    %6 = arith.index_cast %c0_i32_4 : i32 to index
    %c0_5 = arith.constant 0 : index
    %c0_6 = arith.constant 0 : index
    %7 = vector.load %arg1[%6, %c0_5, %c0_6] : memref<1x8x128xf32, #tpu.memory_space<vmem>>, vector<1x8x128xf32>
    %8 = vector.shape_cast %7 : vector<1x8x128xf32> to vector<8x128xf32>
    %9 = arith.addf %5, %8 : vector<8x128xf32>
    %10 = math.tanh %9 : vector<8x128xf32>
    %11 = arith.index_cast %c0_i32_4 : i32 to index
    %c0_7 = arith.constant 0 : index
    %c0_8 = arith.constant 0 : index
    %12 = vector.load %arg4[%11, %c0_7, %c0_8] : memref<1x8x128xf32, #tpu.memory_space<vmem>>, vector<1x8x128xf32>
    %13 = vector.shape_cast %12 : vector<1x8x128xf32> to vector<8x128xf32>
    %14 = vector.shape_cast %10 : vector<8x128xf32> to vector<1x8x128xf32>
    tpu.vector_store %arg4[%11, %c0_7, %c0_8], %14 {strides = array<i32>} : memref<1x8x128xf32, #tpu.memory_space<vmem>>, vector<1x8x128xf32>,
    %c1_i32 = arith.constant 1 : i32
    %c0_9 = arith.constant 0 : index
    %c0_10 = arith.constant 0 : index
    %15 = vector.load %arg5[%c0_9, %c0_10] : memref<8x128xf32, #tpu.memory_space<vmem>>, vector<8x128xf32>
    tpu.vector_store %arg5[%c0_9, %c0_10], %10 {strides = array<i32>} : memref<8x128xf32, #tpu.memory_space<vmem>>, vector<8x128xf32>,
    return
  }
  func.func @transform_0(%arg0: i32) -> (i32, i32, i32) {
    %c0_i32 = arith.constant 0 : i32
    %c0_i32_0 = arith.constant 0 : i32
    %c0_i32_1 = arith.constant 0 : i32
    return %arg0, %c0_i32, %c0_i32_0 : i32, i32, i32
  }
  func.func @transform_1(%arg0: i32) -> (i32, i32) {
    %c0_i32 = arith.constant 0 : i32
    %c0_i32_0 = arith.constant 0 : i32
    %c0_i32_1 = arith.constant 0 : i32
    return %c0_i32, %c0_i32_0 : i32, i32
  }
  func.func @transform_2(%arg0: i32) -> (i32, i32) {
    %c0_i32 = arith.constant 0 : i32
    %c0_i32_0 = arith.constant 0 : i32
    %c0_i32_1 = arith.constant 0 : i32
    return %c0_i32, %c0_i32_0 : i32, i32
  }
  func.func @transform_3(%arg0: i32) -> (i32, i32, i32) {
    %c0_i32 = arith.constant 0 : i32
    %c0_i32_0 = arith.constant 0 : i32
    %c0_i32_1 = arith.constant 0 : i32
    return %arg0, %c0_i32, %c0_i32_0 : i32, i32, i32
  }
}

</mosaic_0001>

<bundles_post_ra>
// kernel: tpu_custom_call.1
= control target key start
LH: loop header
LB: loop body
LE: loop exit
PB: predicated region body
PF: predicated region fallthrough
CT: control target
= control target key end

     0   :  { %8 = vsyncpa [#allocation4], 0  ;;  %s423_s0 = inlined_call_operand.hbm [shape: f32[1,8,128], index: 0, kind: input, shape index: {}]   ;;  %s424_s1 = inlined_call_operand.hbm [shape: f32[8,128], index: 1, kind: input, shape index: {}]   ;;  %s425_s2 = inlined_call_operand.hbm [shape: f32[128,128], index: 2, kind: input, shape index: {}]   ;;  %s426_s3 = inlined_call_operand.hbm [shape: f32[1,8,128], index: 3, kind: output, shape index: {}]  }
   0x1   :  { %9 = vsyncpa [#allocation7], 0 }
   0x2   :  { %10 = vsyncpa [#allocation5], 0  ;;  %s346_s12 = smov [#allocation6]   ;;  %s347_s14 = smov [#allocation3]  }
   0x3   :  { %s27_s13 = sshll.u32 %s346_s12, 4  ;;  %s17_s15 = sshll.u32 %s347_s14, 4  ;;  %s28_s13 = int_to_ptr.vmem [resolvable:$true] %s27_s13  ;;  %s18_s15 = int_to_ptr.vmem [resolvable:$true] %s17_s15 }
   0x4   :  { %s252_s18 = scalar_lea.hbm %s424_s1, 128 }
   0x5   :  { %p253_p0 = scmp.ne.s32.totalorder %s424_s1, %s252_s18  ;;  %p256_p1 = scmp.lt.u32.totalorder %s252_s18, %s424_s1 }
   0x7   :  { %p258_p2 = pnand %p256_p1, %p253_p0 }
   0x9   :  { %261 = shalt.err (!%p258_p2)
}
   0xa   :  { %s262_s23 = scalar_lea.vmem %s28_s13, 128  ;;  %p267_p4 = scmp.lt.s32.totalorder %s28_s13, %s28_s13 }
   0xb   :  { %p263_p3 = scmp.ne.s32.totalorder %s28_s13, %s262_s23  ;;  %p268_p5 = scmp.lt.s32.totalorder %s262_s23, %s262_s23 }
   0xd   :  { %p269_p6 = por %p268_p5, %p267_p4 }
   0xf   :  { %p270_p7 = pnand %p269_p6, %p263_p3 }
  0x11   :  { %273 = shalt.err (!%p270_p7)
}
  0x12   :  { %30 = dma.hbm_to_vmem [thread:$0]  %s424_s1, 128, %s28_s13, [#allocation7]  }
  0x13   :  { %s274_s28 = scalar_lea.hbm %s423_s0, 128 }
  0x14   :  { %p275_p8 = scmp.ne.s32.totalorder %s423_s0, %s274_s28  ;;  %p278_p9 = scmp.lt.u32.totalorder %s274_s28, %s423_s0 }
  0x16   :  { %p280_p10 = pnand %p278_p9, %p275_p8 }
  0x18   :  { %283 = shalt.err (!%p280_p10)
}
  0x19   :  { %s284_s6 = scalar_lea.vmem %s18_s15, 128  ;;  %p289_p12 = scmp.lt.s32.totalorder %s18_s15, %s18_s15 }
  0x1a   :  { %p285_p11 = scmp.ne.s32.totalorder %s18_s15, %s284_s6  ;;  %p290_p13 = scmp.lt.s32.totalorder %s284_s6, %s284_s6 }
  0x1c   :  { %p291_p0 = por %p290_p13, %p289_p12 }
  0x1e   :  { %p292_p1 = pnand %p291_p0, %p285_p11 }
  0x20   :  { %295 = shalt.err (!%p292_p1)
}
  0x21   :  { %20 = dma.hbm_to_vmem [thread:$0]  %s423_s0, 128, %s18_s15, [#allocation4]  }
  0x22   :  { %s348_s8 = smov [#allocation8]   ;;  %s296_s12 = scalar_lea.hbm %s425_s2, 2048 }
  0x23   :  { %s36_s9 = sshll.u32 %s348_s8, 4  ;;  %p297_p2 = scmp.ne.s32.totalorder %s425_s2, %s296_s12  ;;  %s37_s9 = int_to_ptr.vmem [resolvable:$true] %s36_s9 }
  0x24   :  { %p300_p3 = scmp.lt.u32.totalorder %s296_s12, %s425_s2 }
  0x26   :  { %p302_p4 = pnand %p300_p3, %p297_p2 }
  0x28   :  { %305 = shalt.err (!%p302_p4)
}
  0x29   :  { %s306_s18 = scalar_lea.vmem %s37_s9, 2048  ;;  %p311_p6 = scmp.lt.s32.totalorder %s37_s9, %s37_s9 }
  0x2a   :  { %p307_p5 = scmp.ne.s32.totalorder %s37_s9, %s306_s18  ;;  %p312_p7 = scmp.lt.s32.totalorder %s306_s18, %s306_s18 }
  0x2c   :  { %p313_p8 = por %p312_p7, %p311_p6 }
  0x2e   :  { %p314_p9 = pnand %p313_p8, %p307_p5 }
  0x30   :  { %317 = shalt.err (!%p314_p9)
}
  0x31   :  { %s349_s0 = smov 128   ;;  %s350_s15 = smov 8  }
  0x32   :  { %42 = dma.hbm_to_vmem [thread:$0]  %s425_s2, 2048, %s37_s9, [#allocation7], %s349_s0, %s349_s0, %s350_s15  }
  0x33   :  { %340 = dma.done.wait [#allocation4], 128  }
  0x34   :  { %341 = vsyncadd [#allocation4], 4294967168 }
  0x35   :  { %342 = dma.done.wait [#allocation7], 2176  }
  0x36   :  { %343 = vsyncadd [#allocation7], 4294965120  ;;  %v351_v0 = vmov 0.0|0.0   ;;  %vm352_vm0 = vmmov 0   ;;  %v353_v1 = vmov 0.0   ;;  %v58_v2 = vld [vmem:[#allocation8] sm:$0xff] }
  0x37   :  { %217 = vmatprep.subr.bf16.mxu0 %v351_v0  ;;  %214 = vmatprep.mubr.msk.f32.mxu0 %vm352_vm0, %v353_v1  ;;  %v59_v3 = vld [vmem:[#allocation8 + $0x8] sm:$0xff]  ;;  %v60_v4 = vld [vmem:[#allocation8 + $0x10] sm:$0xff]  ;;  %v61_v6 = vld [vmem:[#allocation8 + $0x18] sm:$0xff]  ;;  %s354_s2 = smov [#allocation9]  }
  0x38   :  { %v218_v5 = vpack.c.bf16 %v59_v3, %v58_v2  ;;  %v221_v7 = vpack.c.bf16 %v61_v6, %v60_v4  ;;  %v62_v8 = vld [vmem:[#allocation8 + $0x20] sm:$0xff]  ;;  %v63_v9 = vld [vmem:[#allocation8 + $0x28] sm:$0xff]  ;;  %v64_v11 = vld [vmem:[#allocation8 + $0x30] sm:$0xff]  ;;  %s155_s21 = sshll.u32 %s354_s2, 4  ;;  %s156_s21 = int_to_ptr.vmem [resolvable:$true] %s155_s21 }
  0x39   :  { %v224_v10 = vpack.c.bf16 %v63_v9, %v62_v8  ;;  %v65_v12 = vld [vmem:[#allocation8 + $0x38] sm:$0xff]  ;;  %v66_v14 = vld [vmem:[#allocation8 + $0x40] sm:$0xff]  ;;  %v67_v15 = vld [vmem:[#allocation8 + $0x48] sm:$0xff]  ;;  %s318_s22 = scalar_lea.vmem %s156_s21, 128  ;;  %p323_p11 = scmp.lt.s32.totalorder %s156_s21, %s156_s21 }
  0x3a   :  { %219 = vmatpush3.bf16.msra.mxu0 %v218_v5  ;;  %v227_v13 = vpack.c.bf16 %v65_v12, %v64_v11  ;;  %v230_v16 = vpack.c.bf16 %v67_v15, %v66_v14  ;;  %v68_v17 = vld [vmem:[#allocation8 + $0x50] sm:$0xff]  ;;  %v69_v18 = vld [vmem:[#allocation8 + $0x58] sm:$0xff]  ;;  %v70_v20 = vld [vmem:[#allocation8 + $0x60] sm:$0xff]  ;;  %p319_p10 = scmp.ne.s32.totalorder %s156_s21, %s318_s22  ;;  %p324_p12 = scmp.lt.s32.totalorder %s318_s22, %s318_s22 }
  0x3b   :  { %220 = vmatprep.subr.bf16.mxu0 %v351_v0  ;;  %v233_v19 = vpack.c.bf16 %v69_v18, %v68_v17  ;;  %v71_v21 = vld [vmem:[#allocation8 + $0x68] sm:$0xff]  ;;  %v72_v23 = vld [vmem:[#allocation8 + $0x70] sm:$0xff]  ;;  %v73_v24 = vld [vmem:[#allocation8 + $0x78] sm:$0xff] }
  0x3c   :  { %v236_v22 = vpack.c.bf16 %v71_v21, %v70_v20  ;;  %v239_v25 = vpack.c.bf16 %v73_v24, %v72_v23  ;;  %v56_v26 = vld [vmem:[#allocation6] sm:$0xff]  ;;  %v75_v27 = vld [vmem:[#allocation3] sm:$0xff]  ;;  %p325_p13 = por %p324_p12, %p323_p11 }
  0x3e   :  { %222 = vmatpush3.bf16.msra.mxu0 %v221_v7  ;;  %p326_p0 = pnand %p325_p13, %p319_p10 }
  0x3f   :  { %223 = vmatprep.subr.bf16.mxu0 %v351_v0 }
  0x42   :  { %225 = vmatpush3.bf16.msra.mxu0 %v224_v10 }
  0x43   :  { %226 = vmatprep.subr.bf16.mxu0 %v351_v0 }
  0x46   :  { %228 = vmatpush3.bf16.msra.mxu0 %v227_v13 }
  0x47   :  { %229 = vmatprep.subr.bf16.mxu0 %v351_v0 }
  0x4a   :  { %231 = vmatpush3.bf16.msra.mxu0 %v230_v16 }
  0x4b   :  { %232 = vmatprep.subr.bf16.mxu0 %v351_v0 }
  0x4e   :  { %234 = vmatpush3.bf16.msra.mxu0 %v233_v19 }
  0x4f   :  { %235 = vmatprep.subr.bf16.mxu0 %v351_v0 }
  0x52   :  { %237 = vmatpush3.bf16.msra.mxu0 %v236_v22 }
  0x53   :  { %238 = vmatprep.subr.bf16.mxu0 %v351_v0 }
  0x56   :  { %240 = vmatpush3.bf16.msra.mxu0 %v239_v25 }
  0x59   :  { %215 = vmatmul.mubr.f32.vlgmr.msra.gmra.mrb[0].mxu0 %v56_v26 }
 0x12c   :  { %v142_v28 = vpop.f32.mrb[0].mxu0 }
 0x12d   :  { %v143_v29 = vadd.f32 %v142_v28, %v75_v27  ;;  %v216_v30 = vpop.f32.mrb[1].mxu0 }
 0x12f   :  { %250 = vtanh.f32 %v143_v29 }
 0x139   :  { %v251_v31 = vpop.eup %250 }
 0x13a   :  { %147 = vst [vmem:[#allocation9] sm:$0xff] %v251_v31 }
 0x13b   :  { %329 = shalt.err (!%p326_p0)
}
 0x13c   :  { %s330_s25 = scalar_lea.hbm %s426_s3, 128 }
 0x13d   :  { %p331_p1 = scmp.ne.s32.totalorder %s426_s3, %s330_s25  ;;  %p334_p2 = scmp.lt.u32.totalorder %s330_s25, %s426_s3 }
 0x13f   :  { %p336_p3 = pnand %p334_p2, %p331_p1 }
 0x141   :  { %339 = shalt.err (!%p336_p3)
}
 0x142   :  { %158 = dma.vmem_to_hbm [thread:$0]  %s156_s21, 128, %s426_s3, [#allocation5]  }
 0x143   :  { %344 = dma.done.wait [#allocation5], 128  }
 0x144   :  { %345 = vsyncadd [#allocation5], 4294967168 }
 0x145   :  { %162 = vsyncpa [#allocation4], 1 }
 0x146   :  { %163 = vsyncpa [#allocation7], 1 }
 0x147   :  { %164 = vsyncpa [#allocation5], 1 }

</bundles_post_ra>
